<compile_context>
chip_gen: v6e
topology: v6e:2x2x1
jax: 0.10.0
libtpu: 0.0.40
codegen_flags: <defaults>
</compile_context>

<pallas_src>
import functools

import jax
import jax.numpy as jnp
from jax import lax
from jax.experimental import pallas as pl
from jax.experimental.pallas import tpu as pltpu


def _round_up(a, b):
    return (a + b - 1) // b * b


# ----------------------------- Pallas kernel -------------------------------
def _im2col_conv_kernel(x_lo_ref, x_halo_ref, w_ref, b_ref, o_ref, *,
                        shifts, tm, negative_slope):
    # x_lo_ref:   (tm, C_in)   bf16 — this tile's rows of the flat padded input
    # x_halo_ref: (halo, C_in) bf16 — halo rows right after the tile
    # w_ref: (k*k*C_in, C_out_p) bf16   b_ref: (1, C_out_p) f32
    # o_ref: (tm, C_out_p) f32
    x_full = jnp.concatenate([x_lo_ref[...], x_halo_ref[...]], axis=0)  # (tm+halo, C_in)
    # Lane-axis im2col: pay the shifted-slice retile once, then ONE matmul
    # with K = k*k*C_in (instead of k*k accumulator read-modify-write passes).
    patches = jnp.concatenate([x_full[s:s + tm, :] for s in shifts], axis=1)  # (tm, k*k*C_in)
    acc = jnp.dot(patches, w_ref[...], preferred_element_type=jnp.float32)
    acc = acc + b_ref[...]                              # f32 bias
    o_ref[...] = jnp.where(acc >= 0, acc, negative_slope * acc).astype(o_ref.dtype)


def _conv_leaky_relu_pallas(x_flat, w2, bias2d, *, shifts, tm, halo, num_tiles,
                            negative_slope):
    _, c_in = x_flat.shape
    kk_cin, c_out_p = w2.shape
    m_out = num_tiles * tm

    kernel = functools.partial(_im2col_conv_kernel, shifts=shifts, tm=tm,
                               negative_slope=negative_slope)

    flops = 2 * m_out * kk_cin * c_out_p
    bytes_accessed = (x_flat.size * x_flat.dtype.itemsize               # main stream
                      + num_tiles * halo * c_in * x_flat.dtype.itemsize  # halo stream
                      + w2.size * w2.dtype.itemsize
                      + bias2d.size * bias2d.dtype.itemsize
                      + m_out * c_out_p * 4)                             # f32 output

    return pl.pallas_call(
        kernel,
        out_shape=jax.ShapeDtypeStruct((m_out, c_out_p), jnp.float32),
        grid_spec=pltpu.PrefetchScalarGridSpec(
            num_scalar_prefetch=0,
            grid=(num_tiles,),
            in_specs=[
                # rows [i*tm, i*tm + tm)
                pl.BlockSpec((tm, c_in), lambda i: (i, 0)),
                # halo rows [ (i+1)*tm, (i+1)*tm + halo )   (tm % halo == 0)
                pl.BlockSpec((halo, c_in), lambda i: ((i + 1) * (tm // halo), 0)),
                pl.BlockSpec((kk_cin, c_out_p), lambda i: (0, 0)),
                pl.BlockSpec((1, c_out_p), lambda i: (0, 0)),
            ],
            out_specs=pl.BlockSpec((tm, c_out_p), lambda i: (i, 0)),
        ),
        compiler_params=pltpu.CompilerParams(
            dimension_semantics=("parallel",),
            vmem_limit_bytes=32 * 1024 * 1024),
        cost_estimate=pl.CostEstimate(flops=flops, transcendentals=0,
                                      bytes_accessed=bytes_accessed),
    )(x_flat, x_flat, w2, bias2d)


# ------------------------------ ConvLayer -----------------------------------
class ConvLayer:
    """Conv2d + LeakyReLU(0.1), forward pass on TPU via a fused Pallas kernel."""

    def __init__(self, in_channels, out_channels, kernel_size, stride, padding,
                 key=None):
        self.in_channels = in_channels
        self.out_channels = out_channels
        self.kernel_size = kernel_size
        self.stride = stride
        self.padding = padding
        self.negative_slope = 0.1
        if key is None:
            key = jax.random.PRNGKey(0)
        kw_key, kb_key = jax.random.split(key)
        fan_in = in_channels * kernel_size * kernel_size
        bound = 1.0 / (fan_in ** 0.5)
        # PyTorch Conv2d weight layout: (C_out, C_in, KH, KW)
        self.weight = jax.random.uniform(
            kw_key, (out_channels, in_channels, kernel_size, kernel_size),
            dtype=jnp.float32, minval=-bound, maxval=bound)
        self.bias = jax.random.uniform(
            kb_key, (out_channels,), dtype=jnp.float32,
            minval=-bound, maxval=bound)

    def __call__(self, x_nchw):
        N, C_in, H, W = x_nchw.shape
        k, s, p = self.kernel_size, self.stride, self.padding
        C_out = self.out_channels
        H_pad, W_pad = H + 2 * p, W + 2 * p
        H_out = (H + 2 * p - k) // s + 1
        W_out = (W + 2 * p - k) // s + 1
        # Store only the true C_out lanes when the layer is narrow (masked vst
        # beats 16x write amplification when mem-bound); pad to 128-lane
        # multiples only for genuinely wide layers.
        C_out_p = C_out if C_out <= 128 else _round_up(C_out, 128)

        # Flat-row shift for each kernel tap (kh, kw), kh-major / kw-minor.
        shifts = tuple(kh * W_pad + kw for kh in range(k) for kw in range(k))
        shift_max = shifts[-1]
        halo = _round_up(shift_max + 1, 16)          # bf16 sublane multiple
        M_full = N * H_pad * W_pad

        # ~8 grid steps (>=3 per TensorCore on v7x megacore), tile rows capped
        # at ~512, and tm a multiple of halo so the halo index_map stays Blocked.
        tm = _round_up(min(512, max(halo, _round_up(pl.cdiv(M_full, 8), 16))), halo)
        num_tiles = pl.cdiv(M_full, tm)

        # Tail rows needed for the last tile plus its halo, supplied as whole
        # zero images so spatial pad + tail pad + bf16 feed is a single pass.
        rows_needed = num_tiles * tm + halo
        n_extra = pl.cdiv(rows_needed - M_full, H_pad * W_pad)

        x = jnp.transpose(x_nchw, (0, 2, 3, 1)).astype(jnp.bfloat16)  # NCHW->NHWC bf16
        x = jnp.pad(x, ((0, n_extra), (p, p), (p, p), (0, 0)))
        x_flat = x.reshape((N + n_extra) * H_pad * W_pad, C_in)

        # Weights (C_out, C_in, KH, KW) -> (KH*KW*C_in, C_out_p): row order matches
        # the lane-axis im2col concat order (kh-major, kw, then channel).
        w2 = jnp.transpose(self.weight, (2, 3, 1, 0)).reshape(k * k * C_in, C_out)
        w2 = jnp.pad(w2, ((0, 0), (0, C_out_p - C_out))).astype(jnp.bfloat16)
        b2d = jnp.pad(self.bias, (0, C_out_p - C_out)).reshape(1, C_out_p)

        out = _conv_leaky_relu_pallas(
            x_flat, w2, b2d, shifts=shifts, tm=tm, halo=halo,
            num_tiles=num_tiles, negative_slope=self.negative_slope)

        # TODO(synk): for stride>1, grid over (n, oh) with row offset oh*s so only
        # valid rows are computed instead of the full padded grid + strided slice.
        out = out[:M_full, :C_out].reshape(N, H_pad, W_pad, C_out)
        out = out[:, :(H_out - 1) * s + 1:s, :(W_out - 1) * s + 1:s, :]
        # TODO(synk): return NHWC directly when the consumer accepts it; this final
        # transpose exists only for PyTorch NCHW parity.
        return jnp.transpose(out, (0, 3, 1, 2))


# ------------------------------- main ---------------------------------------
if __name__ == "__main__":
    key = jax.random.PRNGKey(0)
    xkey, pkey = jax.random.split(key)

    N, C_in, H, W = 2, 4, 16, 16
    C_out, ksize, stride, padding = 8, 3, 1, 1

    x = jax.random.normal(xkey, (N, C_in, H, W), dtype=jnp.float32)

    layer = ConvLayer(C_in, C_out, ksize, stride, padding, key=pkey)
    y = jax.block_until_ready(layer(x))
    assert y.shape == (N, C_out, H, W)

    # Reference with the same bf16 input/weight rounding and f32 accumulation.
    ref = lax.conv_general_dilated(
        x.astype(jnp.bfloat16), layer.weight.astype(jnp.bfloat16),
        window_strides=(stride, stride),
        padding=[(padding, padding), (padding, padding)],
        dimension_numbers=("NCHW", "OIHW", "NCHW"),
        preferred_element_type=jnp.float32)
    ref = ref + layer.bias.reshape(1, C_out, 1, 1)
    ref = jnp.where(ref >= 0, ref, 0.1 * ref)
    err = float(jnp.max(jnp.abs(y - ref)))
    assert jnp.allclose(y, ref, atol=1e-4, rtol=1e-4), err

    print("KERNEL_OK")
</pallas_src>

<mosaic_0001>
module attributes {stable_mosaic.version = 11 : i64} {
  func.func @_im2col_conv_kernel(%arg0: i32, %arg1: memref<96x4xbf16, #tpu.memory_space<vmem>>, %arg2: memref<48x4xbf16, #tpu.memory_space<vmem>>, %arg3: memref<36x8xbf16, #tpu.memory_space<vmem>>, %arg4: memref<1x8xf32, #tpu.memory_space<vmem>>, %arg5: memref<96x8xf32, #tpu.memory_space<vmem>>) attributes {dimension_semantics = [#tpu.dimension_semantics<parallel>], iteration_bounds = array<i64: 7>, scalar_prefetch = 0 : i64, scratch_operands = 0 : i64, tpu.core_type = #tpu.core_type<tc>, window_params = [{transform_indices = @transform_0, window_bounds = array<i64: 96, 4>}, {transform_indices = @transform_1, window_bounds = array<i64: 48, 4>}, {pipeline_mode = #tpu.pipeline_mode<synchronous>, transform_indices = @transform_2, window_bounds = array<i64: 36, 8>}, {pipeline_mode = #tpu.pipeline_mode<synchronous>, transform_indices = @transform_3, window_bounds = array<i64: 1, 8>}, {transform_indices = @transform_4, window_bounds = array<i64: 96, 8>}]} {
    %c0 = arith.constant 0 : index
    %c0_0 = arith.constant 0 : index
    %0 = vector.load %arg1[%c0, %c0_0] : memref<96x4xbf16, #tpu.memory_space<vmem>>, vector<96x4xbf16>
    %c0_1 = arith.constant 0 : index
    %c0_2 = arith.constant 0 : index
    %1 = vector.load %arg2[%c0_1, %c0_2] : memref<48x4xbf16, #tpu.memory_space<vmem>>, vector<48x4xbf16>
    %2 = tpu.concatenate %0, %1 in 0 : vector<96x4xbf16>, vector<48x4xbf16> -> vector<144x4xbf16>
    %3 = vector.extract_strided_slice %2 {offsets = [0, 0], sizes = [96, 4], strides = [1, 1]} : vector<144x4xbf16> to vector<96x4xbf16>
    %4 = vector.extract_strided_slice %2 {offsets = [1, 0], sizes = [96, 4], strides = [1, 1]} : vector<144x4xbf16> to vector<96x4xbf16>
    %5 = vector.extract_strided_slice %2 {offsets = [2, 0], sizes = [96, 4], strides = [1, 1]} : vector<144x4xbf16> to vector<96x4xbf16>
    %6 = vector.extract_strided_slice %2 {offsets = [18, 0], sizes = [96, 4], strides = [1, 1]} : vector<144x4xbf16> to vector<96x4xbf16>
    %7 = vector.extract_strided_slice %2 {offsets = [19, 0], sizes = [96, 4], strides = [1, 1]} : vector<144x4xbf16> to vector<96x4xbf16>
    %8 = vector.extract_strided_slice %2 {offsets = [20, 0], sizes = [96, 4], strides = [1, 1]} : vector<144x4xbf16> to vector<96x4xbf16>
    %9 = vector.extract_strided_slice %2 {offsets = [36, 0], sizes = [96, 4], strides = [1, 1]} : vector<144x4xbf16> to vector<96x4xbf16>
    %10 = vector.extract_strided_slice %2 {offsets = [37, 0], sizes = [96, 4], strides = [1, 1]} : vector<144x4xbf16> to vector<96x4xbf16>
    %11 = vector.extract_strided_slice %2 {offsets = [38, 0], sizes = [96, 4], strides = [1, 1]} : vector<144x4xbf16> to vector<96x4xbf16>
    %12 = tpu.concatenate %3, %4, %5, %6, %7, %8, %9, %10, %11 in 1 : vector<96x4xbf16>, vector<96x4xbf16>, vector<96x4xbf16>, vector<96x4xbf16>, vector<96x4xbf16>, vector<96x4xbf16>, vector<96x4xbf16>, vector<96x4xbf16>, vector<96x4xbf16> -> vector<96x36xbf16>
    %c0_3 = arith.constant 0 : index
    %c0_4 = arith.constant 0 : index
    %13 = vector.load %arg3[%c0_3, %c0_4] : memref<36x8xbf16, #tpu.memory_space<vmem>>, vector<36x8xbf16>
    %cst = arith.constant dense<0.000000e+00> : vector<96x8xf32>
    %14 = tpu.matmul %12, %13, %cst {dimension_numbers = #tpu.dot_dimension_numbers<[1], [0], [0], [1], [0, 0, 1, 1], [], []>} : vector<96x36xbf16>, vector<36x8xbf16>, vector<96x8xf32> -> vector<96x8xf32>
    %c0_5 = arith.constant 0 : index
    %c0_6 = arith.constant 0 : index
    %15 = vector.load %arg4[%c0_5, %c0_6] : memref<1x8xf32, #tpu.memory_space<vmem>>, vector<1x8xf32>
    %16 = vector.broadcast %15 : vector<1x8xf32> to vector<96x8xf32>
    %17 = arith.addf %14, %16 : vector<96x8xf32>
    %cst_7 = arith.constant 0.000000e+00 : f32
    %18 = vector.broadcast %cst_7 : f32 to vector<96x8xf32>
    %19 = arith.cmpf oge, %17, %18 : vector<96x8xf32>
    %cst_8 = arith.constant 1.000000e-01 : f32
    %20 = vector.broadcast %cst_8 : f32 to vector<96x8xf32>
    %21 = arith.mulf %20, %17 : vector<96x8xf32>
    %22 = arith.select %19, %17, %21 : vector<96x8xi1>, vector<96x8xf32>
    %c0_9 = arith.constant 0 : index
    %c0_10 = arith.constant 0 : index
    %23 = vector.load %arg5[%c0_9, %c0_10] : memref<96x8xf32, #tpu.memory_space<vmem>>, vector<96x8xf32>
    tpu.vector_store %arg5[%c0_9, %c0_10], %22 {strides = array<i32>} : memref<96x8xf32, #tpu.memory_space<vmem>>, vector<96x8xf32>,
    return
  }
  func.func @transform_0(%arg0: i32) -> (i32, i32) {
    %c0_i32 = arith.constant 0 : i32
    %c0_i32_0 = arith.constant 0 : i32
    return %arg0, %c0_i32 : i32, i32
  }
  func.func @transform_1(%arg0: i32) -> (i32, i32) {
    %c1_i32 = arith.constant 1 : i32
    %0 = arith.addi %arg0, %c1_i32 : i32
    %c2_i32 = arith.constant 2 : i32
    %1 = arith.muli %0, %c2_i32 : i32
    %c0_i32 = arith.constant 0 : i32
    %c0_i32_0 = arith.constant 0 : i32
    return %1, %c0_i32 : i32, i32
  }
  func.func @transform_2(%arg0: i32) -> (i32, i32) {
    %c0_i32 = arith.constant 0 : i32
    %c0_i32_0 = arith.constant 0 : i32
    %c0_i32_1 = arith.constant 0 : i32
    return %c0_i32, %c0_i32_0 : i32, i32
  }
  func.func @transform_3(%arg0: i32) -> (i32, i32) {
    %c0_i32 = arith.constant 0 : i32
    %c0_i32_0 = arith.constant 0 : i32
    %c0_i32_1 = arith.constant 0 : i32
    return %c0_i32, %c0_i32_0 : i32, i32
  }
  func.func @transform_4(%arg0: i32) -> (i32, i32) {
    %c0_i32 = arith.constant 0 : i32
    %c0_i32_0 = arith.constant 0 : i32
    return %arg0, %c0_i32 : i32, i32
  }
}

</mosaic_0001>

<bundles_post_ra>
// kernel: tpu_custom_call.1
= control target key start
LH: loop header
LB: loop body
LE: loop exit
PB: predicated region body
PF: predicated region fallthrough
CT: control target
= control target key end

     0   :  { %s1092_s15 = smov 0   ;;  %s1523_s0 = inlined_call_operand.vmem [shape: bf16[972,4], index: 0, kind: input, shape index: {}]   ;;  %s1524_s1 = inlined_call_operand.vmem [shape: bf16[972,4], index: 1, kind: input, shape index: {}]   ;;  %s1525_s2 = inlined_call_operand.vmem [shape: bf16[36,8], index: 2, kind: input, shape index: {}]   ;;  %s1526_s3 = inlined_call_operand.vmem [shape: f32[1,8], index: 3, kind: input, shape index: {}]   ;;  %s1527_s4 = inlined_call_operand.vmem [shape: f32[672,8], index: 4, kind: output, shape index: {}]  }
   0x1 LB: > { %s949_s16 = sadd.s32 4294967295, %s1057_s15   ;;  %p955_p0 = scmp.ge.s32.totalorder %s1057_s15, 1  ;;  %s1057_s15 = sphi %s1092_s15, %s14_s15  }
   0x2   : > { %p198_p1 = scmp.lt.s32.totalorder %s1057_s15, 8 }
   0x4   : > { %p199_p2 = pnand %p955_p0, %p198_p1 }
   0x5   : > { %s1100_s17 = smul.u32 (!%p199_p2), 12, %s949_s16  ;;  %s253_s18 = sadd.s32 (!%p199_p2), 1, %s949_s16 }
   0x6   : > { %202 = sbr.rel (%p199_p2) target bundleno = 433 (0x1b1), region = 36  ;;  %s1059_s26 = smov (!%p199_p2), 12  }
   0x7   : > { %p244_p3 = scmp.lt.s32.totalorder (!%p199_p2), %s1100_s17, 121  ;;  %s958_s20 = smul.u32 (!%p199_p2), 12, %s253_s18 }
   0x8   : > { %s1060_s30 = smov (!%p199_p2), 8   ;;  %s1061_s5 = smov (!%p199_p2), 20  }
   0x9   : > { %p260_p4 = scmp.lt.s32.totalorder (!%p199_p2), %s958_s20, 121  ;;  %s1062_s6 = smov (!%p199_p2), 4  }
   0xa   : > { %s1063_s7 = smov (!%p199_p2), 16   ;;  %s1064_s8 = smov (!%p199_p2), 24  }
   0xb   : > { %s245_s19 = scalar_select %p244_p3, %s1100_s17, 121  ;;  %vm406_vm0 = vcmask 1046528   ;;  %vm493_vm1 = vcmask 1045504   ;;  %vm341_vm2 = vsmask.f32 7424  ;;  %vm578_vm5 = vcmask 1044480  }
   0xc   : > { %s1529_s20 = smov (!%p260_p4, %s958_s20), 121  ;;  %vm446_vm3 = vsmask.f32 6400  ;;  %vm533_vm4 = vsmask.f32 5376  ;;  %s1065_s9 = smov 28  }
   0xd   : > { %s956_s21 = sshll.u32 %s245_s19, 2  ;;  %s959_s25 = sshll.u32 %s1529_s20, 2  ;;  %vm748_vm6 = vcmask 1041408   ;;  %vm604_vm7 = vcmask 31744   ;;  %vm617_vm8 = vcmask 64512   ;;  %vm630_vm9 = vcmask 97280  }
   0xe   : > { %s1107_s24 = scalar_lea.vmem %s1523_s0, %s956_s21  ;;  %s1154_s29 = scalar_lea.vmem %s1524_s1, %s959_s25  ;;  %vm643_vm10 = vcmask 130048   ;;  %vm656_vm11 = vcmask 162816   ;;  %vm669_vm12 = vcmask 195584   ;;  %vm682_vm13 = vcmask 228352  }
   0xf   : > { %v1110_v0 = vld [vmem:[%s1107_s24 + $0x18] sm:$0xff]   ;;  %v1113_v1 = vld [vmem:[%s1107_s24 + $0x20] sm:$0xff]   ;;  %v1116_v2 = vld [vmem:[%s1107_s24 + $0x10] sm:$0xff]   ;;  %s1066_s10 = smov 32   ;;  %vm695_vm14 = vcmask 261120   ;;  %vm735_vm15 = vcmask 293888  }
  0x10   : > { %v412_v3 = vrot.slane %v1110_v0, 1  ;;  %v414_v4 = vrot.slane %v1113_v1, 1  ;;  %v497_v5 = vrot.slane %v1110_v0, 2  ;;  %v499_v6 = vrot.slane %v1113_v1, 2  ;;  %v1124_v8 = vld [vmem:[%s1107_s24 + $0x28] sm:$0xff]   ;;  %v1194_v35 = vld [vmem:[%s1154_s29] sm:$0xff]  }
  0x11   : > { %v410_v7 = vrot.slane %v1116_v2, 1  ;;  %v1127_v9 = vshll.u32 %v1116_v2, 16  ;;  %v1130_v10 = vshrl.u32 %v1116_v2, 16  ;;  %v1134_v12 = vshll.u32 %v1110_v0, 16  ;;  %v1212_v43 = vld [vmem:[%s1107_s24] sm:$0xff]   ;;  %v1229_v53 = vld [vmem:[%s1107_s24 + $0x8] sm:$0xff]  }
  0x12   : > { %v415_v11 = vsel %vm406_vm0, %v412_v3, %v414_v4  ;;  %v1145_v14 = vsel %vm493_vm1, %v497_v5, %v499_v6  ;;  %v1149_v16 = vshrl.u32 %v1110_v0, 16  ;;  %v416_v17 = vrot.slane %v1124_v8, 1  ;;  %v1242_v58 = vld [vmem:[%s1154_s29 + $0x10] sm:$0xff]   ;;  %v1249_v63 = vld [vmem:[%s1154_s29 + $0x8] sm:$0xff]   ;;  %p272_p5 = scmp.lt.s32.totalorder %s1100_s17, 83 }
  0x13   : > { %438 = vrot.lane.b32.xlu0 %v415_v11, %s1059_s26  ;;  %v1140_v13 = vsel %vm406_vm0, %v410_v7, %v412_v3  ;;  %v360_v15 = vrot.slane %v1127_v9, 1  ;;  %v368_v18 = vrot.slane %v1134_v12, 1  ;;  %v1161_v19 = vshll.u32 %v1113_v1, 16 }
  0x14   : > { %424 = vrot.lane.b32.xlu1 %v1140_v13, %s1060_s30  ;;  %v1164_v20 = vshrl.u32 %v1113_v1, 16  ;;  %v1170_v22 = vshll.u32 %v1124_v8, 16  ;;  %v1173_v23 = vshrl.u32 %v1124_v8, 16  ;;  %v454_v29 = vrot.slane %v1149_v16, 1  ;;  %s1531_s17 = smov (!%p272_p5, %s1100_s17), 83 }
  0x15   : > { %v364_v21 = vor.u32 %v1130_v10, %v360_v15  ;;  %v376_v24 = vrot.slane %v1161_v19, 1  ;;  %v459_v26 = vrot.slane %v1161_v19, 2  ;;  %v372_v28 = vor.u32 %v1149_v16, %v368_v18  ;;  %s960_s21 = sshll.u32 %s1531_s17, 3 }
  0x16   : > { %v458_v25 = vrot.slane %v1164_v20, 1  ;;  %v455_v30 = vrot.slane %v1134_v12, 2  ;;  %v1188_v31 = vsel %vm406_vm0, %v414_v4, %v416_v17  ;;  %v501_v32 = vrot.slane %v1124_v8, 2  ;;  %s1494_s24 = scalar_lea.vmem %s1527_s4, %s960_s21 }
  0x17   : > { %511 = vrot.lane.b32.xlu0 %v1145_v14, %s1061_s5  ;;  %v369_v27 = vsel %vm341_vm2, %v364_v21, %v368_v18  ;;  %v462_v33 = vrot.slane %v1173_v23, 1  ;;  %v463_v34 = vrot.slane %v1170_v22, 2  ;;  %v377_v36 = vsel %vm341_vm2, %v372_v28, %v376_v24 }
  0x18   : > { %426 = vrot.lane.b32.xlu1 %v415_v11, %s1060_s30  ;;  %v460_v37 = vor.u32 %v459_v26, %v458_v25  ;;  %v1202_v38 = vor.u32 %v455_v30, %v454_v29  ;;  %v502_v39 = vsel %vm493_vm1, %v499_v6, %v501_v32  ;;  %v1208_v41 = vshll.u32 %v1194_v35, 16 }
  0x19   : > { %v1205_v40 = vor.u32 %v463_v34, %v462_v33  ;;  %v466_v42 = vshrl.u32 %v1194_v35, 16  ;;  %v503_v44 = vrot.slane %v1194_v35, 2  ;;  %v545_v45 = vrot.slane %v1173_v23, 2 }
  0x1a   : > { %v461_v46 = vsel %vm446_vm3, %v1202_v38, %v460_v37  ;;  %v546_v47 = vrot.slane %v1170_v22, 3  ;;  %v541_v48 = vrot.slane %v1164_v20, 2  ;;  %v542_v49 = vrot.slane %v1161_v19, 3 }
  0x1b   : > { %398 = vrot.lane.b32.xlu0 %v369_v27, %s1062_s6  ;;  %v465_v50 = vsel %vm446_vm3, %v460_v37, %v1205_v40  ;;  %v549_v51 = vrot.slane %v466_v42, 2  ;;  %v550_v52 = vrot.slane %v1208_v41, 3  ;;  %v345_v54 = vshll.u32 %v1212_v43, 16 }
  0x1c   : > { %440 = vrot.lane.b32.xlu1 %v1188_v31, %s1059_s26  ;;  %v1237_v55 = vsel %vm493_vm1, %v501_v32, %v503_v44  ;;  %v547_v56 = vor.u32 %v546_v47, %v545_v45  ;;  %v1239_v57 = vor.u32 %v542_v49, %v541_v48  ;;  %v343_v60 = vshrl.u32 %v1212_v43, 16 }
  0x1d   : > { %v1244_v59 = vor.u32 %v550_v52, %v549_v51  ;;  %v347_v61 = vrot.slane %v345_v54, 1  ;;  %v350_v62 = vshll.u32 %v1229_v53, 16  ;;  %v582_v3 = vrot.slane %v1113_v1, 3 }
  0x1e   : > { %v495_v4 = vrot.slane %v1116_v2, 2  ;;  %v548_v6 = vsel %vm533_vm4, %v1239_v57, %v547_v56  ;;  %v584_v11 = vrot.slane %v1124_v8, 3  ;;  %v505_v18 = vrot.slane %v1249_v63, 2 }
  0x1f   : > { %400 = vrot.lane.b32.xlu0 %v377_v36, %s1062_s6  ;;  %v519_v21 = vrot.slane %v1242_v58, 2  ;;  %v552_v25 = vsel %vm533_vm4, %v547_v56, %v1244_v59  ;;  %v348_v26 = vor.u32 %v347_v61, %v343_v60  ;;  %v352_v27 = vrot.slane %v350_v62, 1  ;;  %v1049_v60 = vld [vmem:[%s1525_s2 + $0x8] sm:$0xff]  }
  0x20   : > { %513 = vrot.lane.b32.xlu1 %v502_v39, %s1061_s5  ;;  %v1270_v28 = vsel %vm493_vm1, %v495_v4, %v497_v5  ;;  %v534_v30 = vrot.slane %v1130_v10, 2  ;;  %v535_v32 = vrot.slane %v1127_v9, 3  ;;  %v537_v33 = vrot.slane %v1149_v16, 2 }
  0x21   : > { %v1275_v29 = vsel %vm493_vm1, %v505_v18, %v519_v21  ;;  %v538_v34 = vrot.slane %v1134_v12, 3  ;;  %v585_v5 = vsel %vm578_vm5, %v582_v3, %v584_v11  ;;  %v380_v36 = vor.u32 %v1164_v20, %v376_v24  ;;  %v1048_v24 = vld [vmem:[%s1525_s2 + $0x10] ss:$0 sps:$4 sm:$0x33]   ;;  %v1050_v21 = vld [vmem:[%s1525_s2] sm:$0xff]  }
  0x22   : > { %v384_v37 = vrot.slane %v1170_v22, 1  ;;  %v353_v45 = vsel %vm341_vm2, %v348_v26, %v352_v27  ;;  %v536_v47 = vor.u32 %v535_v32, %v534_v30  ;;  %v580_v12 = vrot.slane %v1110_v0, 3  ;;  %1022 = vmatprep.subr.msk.bf16.mxu1 %vm748_vm6, %v1048_v24  ;;  %1021 = vmatprep.subr.msk.bf16.mxu0 %vm748_vm6, %v1048_v24 }
  0x23   : > { %485 = vrot.lane.b32.xlu0 %v461_v46, %s1063_s7  ;;  %v586_v46 = vrot.slane %v1194_v35, 3  ;;  %v1291_v16 = vor.u32 %v538_v34, %v537_v33  ;;  %v588_v20 = vrot.slane %v1249_v63, 3  ;;  %v590_v22 = vrot.slane %v1242_v58, 3 }
  0x24   : > { %487 = vrot.lane.b32.xlu1 %v465_v50, %s1063_s7  ;;  %v385_v48 = vsel %vm341_vm2, %v380_v36, %v384_v37  ;;  %v1309_v50 = vsel %vm578_vm5, %v580_v12, %v582_v3  ;;  %v388_v52 = vor.u32 %v1173_v23, %v384_v37  ;;  %v392_v54 = vrot.slane %v1208_v41, 1 }
  0x25   : > { %v1297_v19 = vsel %vm533_vm4, %v536_v47, %v1291_v16  ;;  %v587_v51 = vsel %vm578_vm5, %v584_v11, %v586_v46  ;;  %v1319_v56 = vsel %vm578_vm5, %v588_v20, %v590_v22  ;;  %v750_v61 = vsel %vm748_vm6, %v1048_v24, 0 }
  0x26   : > { %v407_v3 = vrot.slane %v1212_v43, 1  ;;  %1018 = vmatpush3.bf16.msra.mxu1 %v750_v61  ;;  %v393_v11 = vsel %vm341_vm2, %v388_v52, %v392_v54  ;;  %998 = vmatpush3.bf16.msra.mxu0 %v750_v61  ;;  %v432_v30 = vrot.slane %v1249_v63, 1  ;;  %v450_v33 = vrot.slane %v1130_v10, 1 }
  0x27   : > { %525 = vrot.lane.b32.xlu0 %v502_v39, %s1064_s8  ;;  %v354_v39 = vshrl.u32 %v1229_v53, 16  ;;  %1016 = vmatprep.subr.bf16.mxu1 %v1049_v60  ;;  %v468_v34 = vrot.slane %v466_v42, 1  ;;  %v476_v36 = vshll.u32 %v1249_v63, 16  ;;  %v494_v24 = vrot.slane %v1229_v53, 2 }
  0x28   : > { %527 = vrot.lane.b32.xlu1 %v1237_v55, %s1064_s8  ;;  %999 = vmatprep.subr.bf16.mxu0 %v1049_v60 }
  0x29   : > { %v356_v49 = vor.u32 %v354_v39, %v352_v27  ;;  %v447_v32 = vrot.slane %v354_v39, 1 }
  0x2a   : > { %1019 = vmatpush3.bf16.msra.mxu1 %v1049_v60  ;;  %1000 = vmatpush3.bf16.msra.mxu0 %v1049_v60 }
  0x2b   : > { %570 = vrot.lane.b32.xlu0 %v548_v6, %s1065_s9  ;;  %v361_v23 = vsel %vm341_vm2, %v356_v49, %v360_v15  ;;  %v408_v6 = vrot.slane %v1229_v53, 1  ;;  %1017 = vmatprep.subr.bf16.mxu1 %v1050_v21  ;;  %v554_v49 = vrot.slane %v476_v36, 3 }
  0x2c   : > { %572 = vrot.lane.b32.xlu1 %v552_v25, %s1065_s9  ;;  %v418_v25 = vrot.slane %v1194_v35, 1  ;;  %1001 = vmatprep.subr.bf16.mxu0 %v1050_v21 }
  0x2d   : > { %v409_v15 = vsel %vm406_vm0, %v407_v3, %v408_v6  ;;  %v411_v26 = vsel %vm406_vm0, %v408_v6, %v410_v7  ;;  %v451_v7 = vrot.slane %v1127_v9, 2  ;;  %v478_v9 = vrot.slane %v476_v36, 2 }
  0x2e   : > { %1020 = vmatpush3.bf16.msra.mxu1 %v1050_v21  ;;  %v419_v27 = vsel %vm406_vm0, %v416_v17, %v418_v25  ;;  %1002 = vmatpush3.bf16.msra.mxu0 %v1050_v21  ;;  %v469_v17 = vrot.slane %v1208_v41, 2 }
  0x2f   : > { %596 = vrot.lane.b32.xlu0 %v585_v5, %s1066_s10  ;;  %v473_v5 = vshrl.u32 %v1249_v63, 16  ;;  %v452_v39 = vor.u32 %v451_v7, %v450_v33 }
  0x30   : > { %394 = vrot.lane.b32.xlu1 %v353_v45, %s1062_s6  ;;  %v470_v10 = vor.u32 %v469_v17, %v468_v34 }
  0x31   : > { %v475_v45 = vrot.slane %v473_v5, 1  ;;  %v457_v22 = vsel %vm446_vm3, %v452_v39, %v1202_v38  ;;  %v506_v38 = vsel %vm493_vm1, %v503_v44, %v505_v18 }
  0x32   : > { %v471_v42 = vsel %vm446_vm3, %v1205_v40, %v470_v10  ;;  %v553_v40 = vrot.slane %v473_v5, 2 }
  0x33   : > { %402 = vrot.lane.b32.xlu0 %v385_v48, %s1062_s6  ;;  %v479_v47 = vor.u32 %v478_v9, %v475_v45 }
  0x34   : > { %598 = vrot.lane.b32.xlu1 %v587_v51, %s1066_s10  ;;  %v561_v51 = vshll.u32 %v1242_v58, 16 }
  0x35   : > { %v480_v48 = vsel %vm446_vm3, %v470_v10, %v479_v47 }
  0x36   : > { %v563_v54 = vrot.slane %v561_v51, 3 }
  0x37   : > { %396 = vrot.lane.b32.xlu0 %v361_v23, %s1062_s6 }
  0x38   : > { %404 = vrot.lane.b32.xlu1 %v393_v11, %s1062_s6 }
  0x3b   : > { %420 = vrot.lane.b32.xlu0 %v409_v15, %s1060_s30 }
  0x3c   : > { %428 = vrot.lane.b32.xlu1 %v1188_v31, %s1060_s30  ;;  %v448_v31 = vrot.slane %v350_v62, 2  ;;  %v433_v62 = vsel %vm406_vm0, %v418_v25, %v432_v30 }
  0x3e   : > { %v449_v37 = vor.u32 %v448_v31, %v447_v32 }
  0x3f   : > { %422 = vrot.lane.b32.xlu0 %v411_v26, %s1060_s30 }
  0x40   : > { %430 = vrot.lane.b32.xlu1 %v419_v27, %s1060_s30  ;;  %v453_v41 = vsel %vm446_vm3, %v449_v37, %v452_v39 }
  0x43   : > { %434 = vrot.lane.b32.xlu0 %v411_v26, %s1059_s26 }
  0x44   : > { %442 = vrot.lane.b32.xlu1 %v419_v27, %s1059_s26 }
  0x47   : > { %436 = vrot.lane.b32.xlu0 %v1140_v13, %s1059_s26  ;;  %v496_v13 = vsel %vm493_vm1, %v494_v24, %v495_v4  ;;  %v558_v4 = vshrl.u32 %v1242_v58, 16  ;;  %v544_v58 = vsel %vm533_vm4, %v1291_v16, %v1239_v57 }
  0x48   : > { %444 = vrot.lane.b32.xlu1 %v433_v62, %s1059_s26 }
  0x49   : > { %v560_v52 = vrot.slane %v558_v4, 2 }
  0x4b   : > { %481 = vrot.lane.b32.xlu0 %v453_v41, %s1063_s7  ;;  %v564_v18 = vor.u32 %v563_v54, %v560_v52 }
  0x4c   : > { %489 = vrot.lane.b32.xlu1 %v471_v42, %s1063_s7 }
  0x4f   : > { %483 = vrot.lane.b32.xlu0 %v457_v22, %s1063_s7 }
  0x50   : > { %491 = vrot.lane.b32.xlu1 %v480_v48, %s1063_s7 }
  0x53   : > { %507 = vrot.lane.b32.xlu0 %v496_v13, %s1061_s5 }
  0x54   : > { %515 = vrot.lane.b32.xlu1 %v1237_v55, %s1061_s5  ;;  %v555_v55 = vor.u32 %v554_v49, %v553_v40 }
  0x56   : > { %v556_v44 = vsel %vm533_vm4, %v1244_v59, %v555_v55 }
  0x57   : > { %509 = vrot.lane.b32.xlu0 %v1270_v28, %s1061_s5 }
  0x58   : > { %517 = vrot.lane.b32.xlu1 %v506_v38, %s1061_s5 }
  0x5b   : > { %521 = vrot.lane.b32.xlu0 %v1270_v28, %s1064_s8  ;;  %v579_v28 = vrot.slane %v1116_v2, 3 }
  0x5c   : > { %529 = vrot.lane.b32.xlu1 %v506_v38, %s1064_s8 }
  0x5d   : > { %v581_v59 = vsel %vm578_vm5, %v579_v28, %v580_v12 }
  0x5f   : > { %523 = vrot.lane.b32.xlu0 %v1145_v14, %s1064_s8  ;;  %v565_v14 = vsel %vm533_vm4, %v555_v55, %v564_v18 }
  0x60   : > { %531 = vrot.lane.b32.xlu1 %v1275_v29, %s1064_s8  ;;  %v589_v29 = vsel %vm578_vm5, %v586_v46, %v588_v20 }
  0x63   : > { %566 = vrot.lane.b32.xlu0 %v1297_v19, %s1065_s9 }
  0x64   : > { %574 = vrot.lane.b32.xlu1 %v556_v44, %s1065_s9 }
  0x67   : > { %568 = vrot.lane.b32.xlu0 %v544_v58, %s1065_s9 }
  0x68   : > { %576 = vrot.lane.b32.xlu1 %v565_v14, %s1065_s9 }
  0x6b   : > { %592 = vrot.lane.b32.xlu0 %v581_v59, %s1066_s10 }
  0x6c   : > { %600 = vrot.lane.b32.xlu1 %v589_v29, %s1066_s10 }
  0x6f   : > { %594 = vrot.lane.b32.xlu0 %v1309_v50, %s1066_s10 }
  0x70   : > { %602 = vrot.lane.b32.xlu1 %v1319_v56, %s1066_s10 }
  0x85   : > { %v439_v57 = vpop.permute.xlu0 %438 }
  0x86   : > { %v425_v16 = vpop.permute.xlu1 %424 }
  0x89   : > { %v512_v19 = vpop.permute.xlu0 %511 }
  0x8a   : > { %v427_v12 = vpop.permute.xlu1 %426 }
  0x8d   : > { %v399_v60 = vpop.permute.xlu0 %398 }
  0x8e   : > { %v441_v63 = vpop.permute.xlu1 %440  ;;  %v610_v46 = vsel %vm604_vm7, %v1116_v2, %v399_v60 }
  0x8f   : > { %v623_v50 = vsel %vm617_vm8, %v610_v46, %v425_v16 }
  0x90   : > { %v636_v21 = vsel %vm630_vm9, %v623_v50, %v439_v57 }
  0x91   : > { %v401_v61 = vpop.permute.xlu0 %400 }
  0x92   : > { %v514_v35 = vpop.permute.xlu1 %513  ;;  %v612_v56 = vsel %vm604_vm7, %v1110_v0, %v401_v61 }
  0x93   : > { %v625_v11 = vsel %vm617_vm8, %v612_v56, %v427_v12 }
  0x94   : > { %v638_v25 = vsel %vm630_vm9, %v625_v11, %v441_v63 }
  0x95   : > { %v486_v20 = vpop.permute.xlu0 %485 }
  0x96   : > { %v488_v23 = vpop.permute.xlu1 %487  ;;  %v649_v15 = vsel %vm643_vm10, %v636_v21, %v486_v20 }
  0x97   : > { %v662_v27 = vsel %vm656_vm11, %v649_v15, %v512_v19  ;;  %v651_v30 = vsel %vm643_vm10, %v638_v25, %v488_v23 }
  0x98   : > { %v664_v34 = vsel %vm656_vm11, %v651_v30, %v514_v35 }
  0x99   : > { %v526_v3 = vpop.permute.xlu0 %525 }
  0x9a   : > { %v528_v6 = vpop.permute.xlu1 %527  ;;  %v675_v0 = vsel %vm669_vm12, %v662_v27, %v526_v3 }
  0x9b   : > { %v677_v17 = vsel %vm669_vm12, %v664_v34, %v528_v6 }
  0x9d   : > { %v571_v2 = vpop.permute.xlu0 %570 }
  0x9e   : > { %v573_v26 = vpop.permute.xlu1 %572  ;;  %v688_v32 = vsel %vm682_vm13, %v675_v0, %v571_v2 }
  0x9f   : > { %v690_v36 = vsel %vm682_vm13, %v677_v17, %v573_v26 }
  0xa1   : > { %v597_v31 = vpop.permute.xlu0 %596 }
  0xa2   : > { %v395_v33 = vpop.permute.xlu1 %394  ;;  %v701_v7 = vsel %vm695_vm14, %v688_v32, %v597_v31 }
  0xa3   : > { %1007 = vmatprep.mubr.msk.bf16.mxu1 %vm735_vm15, %v701_v7  ;;  %v606_v46 = vsel %vm604_vm7, %v1212_v43, %v395_v33 }
  0xa5   : > { %v403_v5 = vpop.permute.xlu0 %402 }
  0xa6   : > { %v599_v37 = vpop.permute.xlu1 %598  ;;  %v614_v20 = vsel %vm604_vm7, %v1113_v1, %v403_v5 }
  0xa7   : > { %v703_v39 = vsel %vm695_vm14, %v690_v36, %v599_v37  ;;  %v970_v37 = vld [vmem:[%s1526_s3] ss:$0 sm:$0xff] }
  0xa8   : > { %1008 = vmatmul.mubr.msk.bf16.vlgmr.msra.gmra.mxu1 %vm735_vm15, %v703_v39 }
  0xa9   : > { %v397_v62 = vpop.permute.xlu0 %396 }
  0xaa   : > { %v405_v10 = vpop.permute.xlu1 %404  ;;  %v608_v24 = vsel %vm604_vm7, %v1229_v53, %v397_v62 }
  0xab   : > { %v616_v48 = vsel %vm604_vm7, %v1124_v8, %v405_v10 }
  0xad   : > { %v421_v45 = vpop.permute.xlu0 %420 }
  0xae   : > { %v429_v9 = vpop.permute.xlu1 %428  ;;  %v619_v23 = vsel %vm617_vm8, %v606_v46, %v421_v45 }
  0xaf   : > { %v627_v50 = vsel %vm617_vm8, %v614_v20, %v429_v9 }
  0xb1   : > { %v423_v41 = vpop.permute.xlu0 %422 }
  0xb2   : > { %v431_v42 = vpop.permute.xlu1 %430  ;;  %v621_v13 = vsel %vm617_vm8, %v608_v24, %v423_v41 }
  0xb3   : > { %v629_v40 = vsel %vm617_vm8, %v616_v48, %v431_v42 }
  0xb5   : > { %v435_v47 = vpop.permute.xlu0 %434 }
  0xb6   : > { %v443_v22 = vpop.permute.xlu1 %442  ;;  %v632_v56 = vsel %vm630_vm9, %v619_v23, %v435_v47 }
  0xb7   : > { %v640_v6 = vsel %vm630_vm9, %v627_v50, %v443_v22 }
  0xb9   : > { %v437_v38 = vpop.permute.xlu0 %436 }
  0xba   : > { %v634_v49 = vsel %vm630_vm9, %v621_v13, %v437_v38  ;;  %v445_v4 = vpop.permute.xlu1 %444 }
  0xbb   : > { %v642_v51 = vsel %vm630_vm9, %v629_v40, %v445_v4 }
  0xbd   : > { %v482_v55 = vpop.permute.xlu0 %481 }
  0xbe   : > { %v490_v52 = vpop.permute.xlu1 %489  ;;  %v645_v11 = vsel %vm643_vm10, %v632_v56, %v482_v55 }
  0xbf   : > { %v653_v2 = vsel %vm643_vm10, %v640_v6, %v490_v52 }
  0xc1   : > { %v484_v54 = vpop.permute.xlu0 %483 }
  0xc2   : > { %v647_v44 = vsel %vm643_vm10, %v634_v49, %v484_v54  ;;  %v492_v18 = vpop.permute.xlu1 %491 }
  0xc3   : > { %v655_v53 = vsel %vm643_vm10, %v642_v51, %v492_v18 }
  0xc5   : > { %v508_v58 = vpop.permute.xlu0 %507 }
  0xc6   : > { %v516_v8 = vpop.permute.xlu1 %515  ;;  %v658_v43 = vsel %vm656_vm11, %v645_v11, %v508_v58 }
  0xc7   : > { %v666_v25 = vsel %vm656_vm11, %v653_v2, %v516_v8 }
  0xc9   : > { %v510_v28 = vpop.permute.xlu0 %509 }
  0xca   : > { %v660_v14 = vsel %vm656_vm11, %v647_v44, %v510_v28  ;;  %v518_v59 = vpop.permute.xlu1 %517 }
  0xcb   : > { %v668_v29 = vsel %vm656_vm11, %v655_v53, %v518_v59 }
  0xcd   : > { %v522_v57 = vpop.permute.xlu0 %521 }
  0xce   : > { %v530_v16 = vpop.permute.xlu1 %529  ;;  %v671_v26 = vsel %vm669_vm12, %v658_v43, %v522_v57 }
  0xcf   : > { %v679_v27 = vsel %vm669_vm12, %v666_v25, %v530_v16 }
  0xd1   : > { %v524_v19 = vpop.permute.xlu0 %523 }
  0xd2   : > { %v673_v12 = vsel %vm669_vm12, %v660_v14, %v524_v19  ;;  %v532_v60 = vpop.permute.xlu1 %531 }
  0xd3   : > { %v681_v63 = vsel %vm669_vm12, %v668_v29, %v532_v60 }
  0xd5   : > { %v567_v61 = vpop.permute.xlu0 %566 }
  0xd6   : > { %v575_v35 = vpop.permute.xlu1 %574  ;;  %v684_v0 = vsel %vm682_vm13, %v671_v26, %v567_v61 }
  0xd7   : > { %v692_v32 = vsel %vm682_vm13, %v679_v27, %v575_v35 }
  0xd9   : > { %v569_v3 = vpop.permute.xlu0 %568 }
  0xda   : > { %v686_v21 = vsel %vm682_vm13, %v673_v12, %v569_v3  ;;  %v577_v15 = vpop.permute.xlu1 %576 }
  0xdb   : > { %v694_v1 = vsel %vm682_vm13, %v681_v63, %v577_v15 }
  0xdd   : > { %v593_v30 = vpop.permute.xlu0 %592 }
  0xde   : > { %v601_v31 = vpop.permute.xlu1 %600  ;;  %v697_v33 = vsel %vm695_vm14, %v684_v0, %v593_v30 }
  0xdf   : > { %v705_v7 = vsel %vm695_vm14, %v692_v32, %v601_v31  ;;  %1003 = vmatprep.mubr.msk.bf16.mxu0 %vm735_vm15, %v697_v33 }
  0xe0   : > { %1011 = vmatprep.mubr.msk.bf16.mxu1 %vm735_vm15, %v705_v7 }
  0xe1   : > { %v595_v34 = vpop.permute.xlu0 %594 }
  0xe2   : > { %v699_v17 = vsel %vm695_vm14, %v686_v21, %v595_v34  ;;  %v603_v5 = vpop.permute.xlu1 %602 }
  0xe3   : > { %v707_v36 = vsel %vm695_vm14, %v694_v1, %v603_v5  ;;  %1004 = vmatmul.mubr.msk.bf16.vlgmr.msra.gmra.mxu0 %vm735_vm15, %v699_v17 }
  0xe4   : > { %1012 = vmatmul.mubr.msk.bf16.gmra.mxu1 %vm735_vm15, %v707_v36 }
 0x168   : > { %v1009_v39 = vpop.f32.mrf.mxu1 }
 0x169   : > { %v811_v62 = vadd.f32 %v1009_v39, %v970_v37 }
 0x16a   : > { %v802_v10 = vpop.f32.mrf.mxu1 }
 0x16b   : > { %vm839_vm0 = vcmp.ge.f32.partialorder %v811_v62, 0.0  ;;  %v851_v45 = vmul.f32 0.1, %v811_v62  ;;  %v803_v9 = vadd.f32 %v970_v37, %v802_v10 }
 0x16c   : > { %v1010_v41 = vpop.f32.mrf.mxu1 }
 0x16d   : > { %v863_v42 = vsel %vm839_vm0, %v811_v62, %v851_v45  ;;  %vm837_vm1 = vcmp.ge.f32.partialorder %v803_v9, 0.0  ;;  %v849_v47 = vmul.f32 0.1, %v803_v9  ;;  %v814_v22 = vadd.f32 %v1010_v41, %v970_v37 }
 0x16e   : > { %875 = vst.msk [vmem:[%s1494_s24 + $0x30] sm:$0xff] %vm617_vm8, %v863_v42  ;;  %v805_v24 = vpop.f32.mrf.mxu1 }
 0x16f   : > { %v861_v48 = vsel %vm837_vm1, %v803_v9, %v849_v47  ;;  %vm840_vm2 = vcmp.ge.f32.partialorder %v814_v22, 0.0  ;;  %v852_v13 = vmul.f32 0.1, %v814_v22  ;;  %v806_v38 = vadd.f32 %v970_v37, %v805_v24 }
 0x170   : > { %873 = vst.msk [vmem:[%s1494_s24 + $0x20] sm:$0xff] %vm617_vm8, %v861_v48 }
 0x171   : > { %v864_v40 = vsel %vm840_vm2, %v814_v22, %v852_v13  ;;  %vm838_vm3 = vcmp.ge.f32.partialorder %v806_v38, 0.0  ;;  %v850_v49 = vmul.f32 0.1, %v806_v38 }
 0x172   : > { %876 = vst.msk [vmem:[%s1494_s24 + $0x38] sm:$0xff] %vm617_vm8, %v864_v40 }
 0x173   : > { %v862_v4 = vsel %vm838_vm3, %v806_v38, %v850_v49 }
 0x174   : > { %874 = vst.msk [vmem:[%s1494_s24 + $0x28] sm:$0xff] %vm617_vm8, %v862_v4 }
 0x1a3   : > { %v1005_v51 = vpop.f32.mrf.mxu0 }
 0x1a4   : > { %v795_v55 = vadd.f32 %v1005_v51, %v970_v37  ;;  %v1013_v52 = vpop.f32.mrf.mxu1 }
 0x1a5   : > { %v827_v54 = vadd.f32 %v1013_v52, %v970_v37  ;;  %v786_v44 = vpop.f32.mrf.mxu0 }
 0x1a6   : > { %vm835_vm4 = vcmp.ge.f32.partialorder %v795_v55, 0.0  ;;  %v847_v18 = vmul.f32 0.1, %v795_v55  ;;  %v787_v53 = vadd.f32 %v970_v37, %v786_v44  ;;  %v818_v58 = vpop.f32.mrf.mxu1 }
 0x1a7   : > { %vm843_vm5 = vcmp.ge.f32.partialorder %v827_v54, 0.0  ;;  %v855_v8 = vmul.f32 0.1, %v827_v54  ;;  %v819_v28 = vadd.f32 %v970_v37, %v818_v58  ;;  %v1006_v14 = vpop.f32.mrf.mxu0 }
 0x1a8   : > { %v859_v59 = vsel %vm835_vm4, %v795_v55, %v847_v18  ;;  %vm833_vm6 = vcmp.ge.f32.partialorder %v787_v53, 0.0  ;;  %v845_v29 = vmul.f32 0.1, %v787_v53  ;;  %v798_v57 = vadd.f32 %v1006_v14, %v970_v37  ;;  %v1014_v16 = vpop.f32.mrf.mxu1 }
 0x1a9   : > { %871 = vst.msk [vmem:[%s1494_s24 + $0x10] sm:$0xff] %vm617_vm8, %v859_v59  ;;  %v867_v19 = vsel %vm843_vm5, %v827_v54, %v855_v8  ;;  %vm841_vm7 = vcmp.ge.f32.partialorder %v819_v28, 0.0  ;;  %v853_v12 = vmul.f32 0.1, %v819_v28  ;;  %v830_v60 = vadd.f32 %v1014_v16, %v970_v37  ;;  %v789_v63 = vpop.f32.mrf.mxu0 }
 0x1aa   : > { %879 = vst.msk [vmem:[%s1494_s24 + $0x50] sm:$0xff] %vm617_vm8, %v867_v19  ;;  %v857_v61 = vsel %vm833_vm6, %v787_v53, %v845_v29  ;;  %vm836_vm9 = vcmp.ge.f32.partialorder %v798_v57, 0.0  ;;  %v848_v35 = vmul.f32 0.1, %v798_v57  ;;  %v790_v46 = vadd.f32 %v970_v37, %v789_v63  ;;  %v821_v20 = vpop.f32.mrf.mxu1 }
 0x1ab   : > { %869 = vst.msk [vmem:[%s1494_s24] sm:$0xff] %vm617_vm8, %v857_v61  ;;  %v865_v23 = vsel %vm841_vm7, %v819_v28, %v853_v12  ;;  %vm844_vm10 = vcmp.ge.f32.partialorder %v830_v60, 0.0  ;;  %v856_v50 = vmul.f32 0.1, %v830_v60  ;;  %v822_v56 = vadd.f32 %v970_v37, %v821_v20 }
 0x1ac   : > { %877 = vst.msk [vmem:[%s1494_s24 + $0x40] sm:$0xff] %vm617_vm8, %v865_v23  ;;  %v860_v3 = vsel %vm836_vm9, %v798_v57, %v848_v35  ;;  %vm834_vm11 = vcmp.ge.f32.partialorder %v790_v46, 0.0  ;;  %v846_v6 = vmul.f32 0.1, %v790_v46 }
 0x1ad   : > { %872 = vst.msk [vmem:[%s1494_s24 + $0x18] sm:$0xff] %vm617_vm8, %v860_v3  ;;  %v868_v11 = vsel %vm844_vm10, %v830_v60, %v856_v50  ;;  %vm842_vm12 = vcmp.ge.f32.partialorder %v822_v56, 0.0  ;;  %v854_v21 = vmul.f32 0.1, %v822_v56 }
 0x1ae   : > { %880 = vst.msk [vmem:[%s1494_s24 + $0x58] sm:$0xff] %vm617_vm8, %v868_v11  ;;  %v858_v15 = vsel %vm834_vm11, %v790_v46, %v846_v6 }
 0x1af   : > { %870 = vst.msk [vmem:[%s1494_s24 + $0x8] sm:$0xff] %vm617_vm8, %v858_v15  ;;  %v866_v2 = vsel %vm842_vm12, %v822_v56, %v854_v21 }
 0x1b0   : > { %878 = vst.msk [vmem:[%s1494_s24 + $0x48] sm:$0xff] %vm617_vm8, %v866_v2 }
 0x1b1 PF: > { %s14_s15 = sadd.s32 1, %s1057_s15  }
 0x1b2   : > { %p11_p6 = scmp.ge.s32.totalorder %s14_s15, 9  }
 0x1b4   :  { %13 = sbr.rel (!%p11_p6) target bundleno = 1 (0x1), region = 69 }

</bundles_post_ra>
